<compile_context>
chip_gen: v6e
topology: v6e:2x2x1
jax: 0.10.0
libtpu: 0.0.40
codegen_flags: <defaults>
</compile_context>

<pallas_src>
import functools

import jax
import jax.numpy as jnp
from jax.experimental import pallas as pl
from jax.experimental.pallas import tpu as pltpu


# ----------------------------------------------------------------------------
# Helpers: VMEM budget + tile selection
# ----------------------------------------------------------------------------
def _round_up(a, m):
    return (a + m - 1) // m * m


def _vmem_limit_bytes():
    """Scoped-VMEM limit: physical capacity minus a small headroom for the
    compiler's internal scratch.  Explicit override is mandatory on v5e (whose
    default scoped limit is only 16 MiB)."""
    try:
        cap = int(pltpu.get_tpu_info().vmem_capacity_bytes)
    except Exception:
        cap = 64 * 1024 * 1024  # conservative (v7x-sized) fallback
    return max(32 * 1024 * 1024, cap - 8 * 1024 * 1024)


def _moe_vmem_estimate(t_tile, H, f_tile, itemsize):
    """Rough per-step VMEM footprint (bytes) of the expert kernel."""
    x_blk = t_tile * H * itemsize
    o_blk = t_tile * H * itemsize
    w_blk = 3 * H * f_tile * itemsize          # w1 + w3 + w2 blocks per step
    s_blk = t_tile * 128 * 4                   # (t,1) f32 scale, lane-padded
    dbl = 2 * (x_blk + o_blk + w_blk + s_blk)  # pipeline double-buffering
    acc = t_tile * H * 4                       # f32 accumulator scratch
    interm = 3 * t_tile * f_tile * 4 + t_tile * f_tile * itemsize  # h1/h3/act
    return dbl + acc + interm


def _pick_tiles(T, H, F, itemsize, budget, t_sub):
    """Tile selection.

    Prefill: maximize t_tile first (weight HBM traffic ~ 1/t_tile), keeping a
    healthy f_tile (>=512 when F allows -> >=12 MiB weight DMA per step at
    H=4096 bf16); shrink f_tile only before giving up t_tile below the
    ~256-row compute-bound floor.
    Decode / small batch: t_tile is pinned by the batch; take the largest
    f_tile that fits (fewest grid steps; total weight traffic is fixed).
    """
    t_full = _round_up(max(T, 1), t_sub)
    t_max = min(t_full, 1024)

    def fits(t, f):
        return _moe_vmem_estimate(t, H, f, itemsize) <= budget

    t_cands = sorted(
        {t_max} | {t for t in (768, 512, 384, 256, 192, 128, 96, 64, 48, 32, 16, 8)
                   if t % t_sub == 0 and t < t_max},
        reverse=True)
    if F <= 512:
        f_cands = [F]
    else:
        f_cands = sorted(
            {f for f in (2048, 1536, 1024, 768, 512, 256, 128) if f <= F}
            | ({F} if F <= 2048 else set()),
            reverse=True)
    f_main = F if F <= 512 else 512
    t_floor = 256  # ~compute-bound row count against streamed expert weights

    # Phase 1 (prefill): maximize t_tile with f_main.
    for t in t_cands:
        if t < t_floor:
            break
        if fits(t, f_main):
            return t, f_main
    # Phase 2 (tight VMEM): trade f_tile down before dropping t below the floor.
    for f in (f for f in f_cands if f < f_main):
        for t in t_cands:
            if t < t_floor:
                break
            if fits(t, f):
                return t, f
    # Phase 3 (decode / small batch / tiny VMEM): t is small; maximize f_tile.
    for t in t_cands:
        for f in f_cands:
            if fits(t, f):
                return t, f
    return t_cands[-1], f_cands[-1]


def _pick_gate_tile(T, H, Ep, itemsize, budget, t_sub):
    """Gate kernel tile: one large token block (its working set is tiny)."""
    t_full = _round_up(max(T, 1), t_sub)
    t_max = min(t_full, 4096)
    cands = sorted(
        {t_max} | {t for t in (2048, 1024, 512, 256, 128, 64, 32, 16, 8)
                   if t % t_sub == 0 and t < t_max},
        reverse=True)
    for t in cands:
        need = 2 * (t * H * itemsize + H * Ep * itemsize + t * Ep * 4)
        if need <= budget:
            return t
    return cands[-1]


# ----------------------------------------------------------------------------
# Kernel 1: router gate  (T, H) @ (H, E_pad) -> (T, E_pad), lane-dense output
# ----------------------------------------------------------------------------
def _gate_kernel(x_ref, gw_ref, o_ref):
    o_ref[...] = jnp.dot(
        x_ref[...], gw_ref[...], preferred_element_type=jnp.float32
    )


def router_logits_pallas(x, gate_w_padded, *, t_tile, vmem_limit):
    T, H = x.shape
    Ep = gate_w_padded.shape[1]
    return pl.pallas_call(
        _gate_kernel,
        out_shape=jax.ShapeDtypeStruct((T, Ep), jnp.float32),
        grid_spec=pltpu.PrefetchScalarGridSpec(
            num_scalar_prefetch=0,
            grid=(T // t_tile,),
            in_specs=[
                pl.BlockSpec((t_tile, H), lambda t: (t, 0)),
                pl.BlockSpec((H, Ep), lambda t: (0, 0)),
            ],
            out_specs=pl.BlockSpec((t_tile, Ep), lambda t: (t, 0)),
        ),
        compiler_params=pltpu.CompilerParams(
            dimension_semantics=("parallel",),
            vmem_limit_bytes=vmem_limit,
        ),
    )(x, gate_w_padded)


# ----------------------------------------------------------------------------
# Kernel 2: tiled, expert-skipping MoE accumulation.
# grid = (T_tiles, F_tiles, E).  The expert axis is remapped through the
# scalar-prefetched active_ids table, so padded (inactive) slots reuse the
# previous block indices (no weight DMA) and their compute is skipped.
# Accumulation over F and active experts happens in a f32 VMEM scratch.
# ----------------------------------------------------------------------------
def _moe_kernel(active_ids_ref, n_active_ref,          # scalar prefetch (SMEM)
                x_ref, w1_ref, w3_ref, w2_ref, s_ref,  # VMEM input blocks
                out_ref,                               # VMEM output block
                acc_ref):                              # f32 scratch
    f = pl.program_id(1)
    e = pl.program_id(2)
    nf = pl.num_programs(1)
    ne = pl.num_programs(2)

    @pl.when((f == 0) & (e == 0))
    def _init():
        acc_ref[...] = jnp.zeros_like(acc_ref)

    @pl.when(e < n_active_ref[0])
    def _compute():
        x = x_ref[...]                                                  # (Tt, H)
        h1 = jnp.dot(x, w1_ref[0], preferred_element_type=jnp.float32)  # (Tt, Ft)
        h3 = jnp.dot(x, w3_ref[0], preferred_element_type=jnp.float32)  # (Tt, Ft)
        act = (h1 * jax.nn.sigmoid(h1)) * h3                            # SiLU(h1)*h3
        act = act * s_ref[0]              # fold per-token routing weight (Tt, 1)
        acc_ref[...] += jnp.dot(
            act.astype(x.dtype), w2_ref[0], preferred_element_type=jnp.float32
        )                                                               # (Tt, H)

    @pl.when((f == nf - 1) & (e == ne - 1))
    def _finalize():
        out_ref[...] = acc_ref[...].astype(out_ref.dtype)


def moe_experts_pallas(active_ids, n_active, x, w1, w3, w2, expert_token_weight,
                       *, t_tile, f_tile, vmem_limit):
    """x: (T,H); w1,w3: (E,H,F); w2: (E,F,H); expert_token_weight: (E,T,1) f32.

    T and F must already be padded to multiples of t_tile / f_tile.
    """
    T, H = x.shape
    E, _, F = w1.shape
    grid = (T // t_tile, F // f_tile, E)
    return pl.pallas_call(
        _moe_kernel,
        out_shape=jax.ShapeDtypeStruct((T, H), x.dtype),
        grid_spec=pltpu.PrefetchScalarGridSpec(
            num_scalar_prefetch=2,
            grid=grid,
            in_specs=[
                pl.BlockSpec((t_tile, H), lambda t, f, e, ids, na: (t, 0)),
                pl.BlockSpec((1, H, f_tile), lambda t, f, e, ids, na: (ids[e], 0, f)),
                pl.BlockSpec((1, H, f_tile), lambda t, f, e, ids, na: (ids[e], 0, f)),
                pl.BlockSpec((1, f_tile, H), lambda t, f, e, ids, na: (ids[e], f, 0)),
                pl.BlockSpec((1, t_tile, 1), lambda t, f, e, ids, na: (ids[e], t, 0)),
            ],
            out_specs=pl.BlockSpec((t_tile, H), lambda t, f, e, ids, na: (t, 0)),
            scratch_shapes=[pltpu.VMEM((t_tile, H), jnp.float32)],
        ),
        compiler_params=pltpu.CompilerParams(
            dimension_semantics=("parallel", "arbitrary", "arbitrary"),
            vmem_limit_bytes=vmem_limit,
        ),
    )(active_ids, n_active, x, w1, w3, w2, expert_token_weight)


# ----------------------------------------------------------------------------
# Wrapper reproducing SparseMoeWrapper.forward
# ----------------------------------------------------------------------------
def sparse_moe_forward(hidden_states, gate_w, w1, w3, w2, top_k):
    B, S, H = hidden_states.shape
    E, _, F = w1.shape
    dtype = hidden_states.dtype
    itemsize = jnp.dtype(dtype).itemsize
    t_sub = max(8, 32 // itemsize)  # sublane packing: 8 f32 / 16 bf16 / 32 int8

    x = hidden_states.reshape(-1, H)                   # (T, H)
    T = x.shape[0]

    vmem_limit = _vmem_limit_bytes()
    budget = int(0.85 * vmem_limit)
    t_tile, f_tile = _pick_tiles(T, H, F, itemsize, budget, t_sub)
    T_pad = _round_up(T, t_tile)
    F_pad = _round_up(F, f_tile)

    # --- Router gate (Pallas, own large token tile, lane-padded output) ------
    E_pad = _round_up(max(E, 128), 128)
    gate_w_p = jnp.pad(gate_w.astype(dtype), ((0, 0), (0, E_pad - E)))
    t_gate = _pick_gate_tile(T, H, E_pad, itemsize, budget, t_sub)
    T_g = _round_up(T, t_gate)
    x_g = x if T_g == T else jnp.pad(x, ((0, T_g - T), (0, 0)))
    router_logits = router_logits_pallas(
        x_g, gate_w_p, t_tile=t_gate, vmem_limit=vmem_limit)[:T, :E]     # (T, E) f32

    # --- Routing glue (tiny: softmax over E, top-k, renormalize) — plain JAX -
    routing_weights = jax.nn.softmax(router_logits, axis=1)
    topk_w, topk_idx = jax.lax.top_k(routing_weights, top_k)             # (T, K)
    topk_w = topk_w / jnp.sum(topk_w, axis=-1, keepdims=True)
    topk_w = topk_w.astype(dtype)
    # NOTE: self.threshold == 0 in the reference, so the single-token threshold
    # branch is dead code and not reproduced.

    # Per-expert per-token combined routing weight (0 if token not routed).
    one_hot = jax.nn.one_hot(topk_idx, E, dtype=jnp.float32)             # (T, K, E)
    expert_token_weight = jnp.einsum(
        "tk,tke->et", topk_w.astype(jnp.float32), one_hot)               # (E, T)

    # Active-expert table for scalar prefetch: active ids first, rest repeat
    # the last active id so padded grid slots re-use the same weight blocks
    # (no DMA) and their compute is skipped inside the kernel.
    tokens_per_expert = jnp.sum(one_hot, axis=(0, 1))                    # (E,)
    is_active = tokens_per_expert > 0
    n_active = jnp.sum(is_active.astype(jnp.int32))
    order = jnp.argsort(jnp.logical_not(is_active).astype(jnp.int32))    # actives first
    active_ids = order[jnp.minimum(jnp.arange(E), n_active - 1)].astype(jnp.int32)
    n_active_arr = jnp.reshape(n_active, (1,)).astype(jnp.int32)

    x_pad = x if T_pad == T else jnp.pad(x, ((0, T_pad - T), (0, 0)))
    etw = expert_token_weight
    if T_pad != T:
        etw = jnp.pad(etw, ((0, 0), (0, T_pad - T)))
    etw = etw.reshape(E, T_pad, 1)

    # NOTE: for common F (e.g. 14336) f_tile divides F so no weight copy occurs;
    # if it did not, the weights should be pre-padded once by the caller.
    if F_pad != F:
        w1p = jnp.pad(w1, ((0, 0), (0, 0), (0, F_pad - F)))
        w3p = jnp.pad(w3, ((0, 0), (0, 0), (0, F_pad - F)))
        w2p = jnp.pad(w2, ((0, 0), (0, F_pad - F), (0, 0)))
    else:
        w1p, w3p, w2p = w1, w3, w2

    final = moe_experts_pallas(
        active_ids, n_active_arr, x_pad, w1p, w3p, w2p, etw,
        t_tile=t_tile, f_tile=f_tile, vmem_limit=vmem_limit)             # (T_pad, H)
    final = final[:T]
    return final.reshape(B, S, H), router_logits


# ----------------------------------------------------------------------------
# Pure-JAX reference for a correctness check.
# ----------------------------------------------------------------------------
def sparse_moe_reference(hidden_states, gate_w, w1, w3, w2, top_k):
    B, S, H = hidden_states.shape
    E = gate_w.shape[1]
    x = hidden_states.reshape(-1, H)
    logits = (x @ gate_w).astype(jnp.float32)
    rw = jax.nn.softmax(logits, axis=1)
    tw, ti = jax.lax.top_k(rw, top_k)
    tw = tw / jnp.sum(tw, axis=-1, keepdims=True)
    tw = tw.astype(x.dtype)
    one_hot = jax.nn.one_hot(ti, E, dtype=tw.dtype)
    etw = jnp.einsum("tk,tke->et", tw, one_hot)  # (E, T)
    out = jnp.zeros(x.shape, dtype=jnp.float32)
    for e in range(E):
        h1 = x @ w1[e]
        h3 = x @ w3[e]
        y = (h1 * jax.nn.sigmoid(h1) * h3) @ w2[e]
        out = out + y.astype(jnp.float32) * etw[e][:, None].astype(jnp.float32)
    return out.astype(x.dtype).reshape(B, S, H), logits


if __name__ == "__main__":
    # Small config consistent with the module: Mixtral-style MoE block.
    hidden_dim = 32
    ffn_dim = 64
    num_experts = 8
    top_k = 2

    key = jax.random.PRNGKey(0)
    k_x, k_g, k1, k3, k2, k_x2 = jax.random.split(key, 6)

    gate_w = jax.random.normal(
        k_g, (hidden_dim, num_experts), dtype=jnp.float32
    ) * 0.1
    w1 = jax.random.normal(
        k1, (num_experts, hidden_dim, ffn_dim), dtype=jnp.float32
    ) * 0.1
    w3 = jax.random.normal(
        k3, (num_experts, hidden_dim, ffn_dim), dtype=jnp.float32
    ) * 0.1
    w2 = jax.random.normal(
        k2, (num_experts, ffn_dim, hidden_dim), dtype=jnp.float32
    ) * 0.1

    run = jax.jit(functools.partial(sparse_moe_forward, top_k=top_k))

    # Test 1: batch=2, seq=8 (aligned token count).
    hidden_states = jax.random.normal(
        k_x, (2, 8, hidden_dim), dtype=jnp.float32
    )
    out, logits = run(hidden_states, gate_w, w1, w3, w2)
    jax.block_until_ready(out)
    jax.block_until_ready(logits)
    ref_out, ref_logits = sparse_moe_reference(
        hidden_states, gate_w, w1, w3, w2, top_k
    )
    assert jnp.allclose(out, ref_out, atol=1e-3, rtol=1e-3), (
        float(jnp.max(jnp.abs(out - ref_out))))
    assert jnp.allclose(logits, ref_logits, atol=1e-3, rtol=1e-3), (
        float(jnp.max(jnp.abs(logits - ref_logits))))

    # Test 2: batch=1, seq=5 (exercises token padding / slicing paths).
    hidden_states2 = jax.random.normal(
        k_x2, (1, 5, hidden_dim), dtype=jnp.float32
    )
    out2, logits2 = run(hidden_states2, gate_w, w1, w3, w2)
    jax.block_until_ready(out2)
    jax.block_until_ready(logits2)
    ref_out2, ref_logits2 = sparse_moe_reference(
        hidden_states2, gate_w, w1, w3, w2, top_k
    )
    assert jnp.allclose(out2, ref_out2, atol=1e-3, rtol=1e-3), (
        float(jnp.max(jnp.abs(out2 - ref_out2))))
    assert jnp.allclose(logits2, ref_logits2, atol=1e-3, rtol=1e-3), (
        float(jnp.max(jnp.abs(logits2 - ref_logits2))))

    print("KERNEL_OK")
</pallas_src>

<mosaic_0001>
module attributes {stable_mosaic.version = 11 : i64} {
  func.func @_gate_kernel(%arg0: i32, %arg1: memref<16x32xf32, #tpu.memory_space<vmem>>, %arg2: memref<32x128xf32, #tpu.memory_space<vmem>>, %arg3: memref<16x128xf32, #tpu.memory_space<vmem>>) attributes {dimension_semantics = [#tpu.dimension_semantics<parallel>], iteration_bounds = array<i64: 1>, scalar_prefetch = 0 : i64, scratch_operands = 0 : i64, tpu.core_type = #tpu.core_type<tc>, window_params = [{transform_indices = @transform_0, window_bounds = array<i64: 16, 32>}, {pipeline_mode = #tpu.pipeline_mode<synchronous>, transform_indices = @transform_1, window_bounds = array<i64: 32, 128>}, {transform_indices = @transform_2, window_bounds = array<i64: 16, 128>}]} {
    %c0 = arith.constant 0 : index
    %c0_0 = arith.constant 0 : index
    %0 = vector.load %arg1[%c0, %c0_0] : memref<16x32xf32, #tpu.memory_space<vmem>>, vector<16x32xf32>
    %c0_1 = arith.constant 0 : index
    %c0_2 = arith.constant 0 : index
    %1 = vector.load %arg2[%c0_1, %c0_2] : memref<32x128xf32, #tpu.memory_space<vmem>>, vector<32x128xf32>
    %cst = arith.constant dense<0.000000e+00> : vector<16x128xf32>
    %2 = tpu.matmul %0, %1, %cst {dimension_numbers = #tpu.dot_dimension_numbers<[1], [0], [0], [1], [0, 0, 1, 1], [], []>} : vector<16x32xf32>, vector<32x128xf32>, vector<16x128xf32> -> vector<16x128xf32>
    %c0_3 = arith.constant 0 : index
    %c0_4 = arith.constant 0 : index
    %3 = vector.load %arg3[%c0_3, %c0_4] : memref<16x128xf32, #tpu.memory_space<vmem>>, vector<16x128xf32>
    tpu.vector_store %arg3[%c0_3, %c0_4], %2 {strides = array<i32>} : memref<16x128xf32, #tpu.memory_space<vmem>>, vector<16x128xf32>,
    return
  }
  func.func @transform_0(%arg0: i32) -> (i32, i32) {
    %c0_i32 = arith.constant 0 : i32
    %c0_i32_0 = arith.constant 0 : i32
    return %arg0, %c0_i32 : i32, i32
  }
  func.func @transform_1(%arg0: i32) -> (i32, i32) {
    %c0_i32 = arith.constant 0 : i32
    %c0_i32_0 = arith.constant 0 : i32
    %c0_i32_1 = arith.constant 0 : i32
    return %c0_i32, %c0_i32_0 : i32, i32
  }
  func.func @transform_2(%arg0: i32) -> (i32, i32) {
    %c0_i32 = arith.constant 0 : i32
    %c0_i32_0 = arith.constant 0 : i32
    return %arg0, %c0_i32 : i32, i32
  }
}

module attributes {stable_mosaic.version = 11 : i64} {
  func.func @_moe_kernel(%arg0: i32, %arg1: i32, %arg2: i32, %arg3: memref<8xi32, #tpu.memory_space<smem>>, %arg4: memref<1xi32, #tpu.memory_space<smem>>, %arg5: memref<16x32xf32, #tpu.memory_space<vmem>>, %arg6: memref<1x32x64xf32, #tpu.memory_space<vmem>>, %arg7: memref<1x32x64xf32, #tpu.memory_space<vmem>>, %arg8: memref<1x64x32xf32, #tpu.memory_space<vmem>>, %arg9: memref<1x16x1xf32, #tpu.memory_space<vmem>>, %arg10: memref<16x32xf32, #tpu.memory_space<vmem>>, %arg11: memref<16x32xf32, #tpu.memory_space<vmem>>) attributes {dimension_semantics = [#tpu.dimension_semantics<parallel>, #tpu.dimension_semantics<arbitrary>, #tpu.dimension_semantics<arbitrary>], iteration_bounds = array<i64: 1, 1, 8>, scalar_prefetch = 2 : i64, scratch_operands = 1 : i64, tpu.core_type = #tpu.core_type<tc>, window_params = [{transform_indices = @transform_0, window_bounds = array<i64: 16, 32>}, {transform_indices = @transform_1, window_bounds = array<i64: 1, 32, 64>}, {transform_indices = @transform_2, window_bounds = array<i64: 1, 32, 64>}, {transform_indices = @transform_3, window_bounds = array<i64: 1, 64, 32>}, {transform_indices = @transform_4, window_bounds = array<i64: 1, 16, 1>}, {transform_indices = @transform_5, window_bounds = array<i64: 16, 32>}]} {
    %c0_i32 = arith.constant 0 : i32
    %0 = arith.cmpi eq, %arg1, %c0_i32 : i32
    %c0_i32_0 = arith.constant 0 : i32
    %1 = arith.cmpi eq, %arg2, %c0_i32_0 : i32
    %2 = arith.andi %0, %1 : i1
    %3 = arith.extui %2 : i1 to i32
    %c0_i32_1 = arith.constant 0 : i32
    %4 = arith.cmpi ne, %3, %c0_i32_1 : i32
    scf.if %4 {
      %cst = arith.constant 0.000000e+00 : f32
      %14 = vector.broadcast %cst : f32 to vector<16x32xf32>
      %c0_5 = arith.constant 0 : index
      %c0_6 = arith.constant 0 : index
      %15 = vector.load %arg11[%c0_5, %c0_6] : memref<16x32xf32, #tpu.memory_space<vmem>>, vector<16x32xf32>
      tpu.vector_store %arg11[%c0_5, %c0_6], %14 {strides = array<i32>} : memref<16x32xf32, #tpu.memory_space<vmem>>, vector<16x32xf32>,
    } else {
    }
    %c0 = arith.constant 0 : index
    %5 = memref.load %arg4[%c0] : memref<1xi32, #tpu.memory_space<smem>>
    %6 = arith.cmpi slt, %arg2, %5 : i32
    %7 = arith.extui %6 : i1 to i32
    %c0_i32_2 = arith.constant 0 : i32
    %8 = arith.cmpi ne, %7, %c0_i32_2 : i32
    scf.if %8 {
      %c0_5 = arith.constant 0 : index
      %c0_6 = arith.constant 0 : index
      %14 = vector.load %arg5[%c0_5, %c0_6] : memref<16x32xf32, #tpu.memory_space<vmem>>, vector<16x32xf32>
      %c0_7 = arith.constant 0 : index
      %c0_8 = arith.constant 0 : index
      %c0_9 = arith.constant 0 : index
      %15 = vector.load %arg6[%c0_7, %c0_8, %c0_9] : memref<1x32x64xf32, #tpu.memory_space<vmem>>, vector<1x32x64xf32>
      %16 = vector.shape_cast %15 : vector<1x32x64xf32> to vector<32x64xf32>
      %cst = arith.constant dense<0.000000e+00> : vector<16x64xf32>
      %17 = tpu.matmul %14, %16, %cst {dimension_numbers = #tpu.dot_dimension_numbers<[1], [0], [0], [1], [0, 0, 1, 1], [], []>} : vector<16x32xf32>, vector<32x64xf32>, vector<16x64xf32> -> vector<16x64xf32>
      %c0_10 = arith.constant 0 : index
      %c0_11 = arith.constant 0 : index
      %c0_12 = arith.constant 0 : index
      %18 = vector.load %arg7[%c0_10, %c0_11, %c0_12] : memref<1x32x64xf32, #tpu.memory_space<vmem>>, vector<1x32x64xf32>
      %19 = vector.shape_cast %18 : vector<1x32x64xf32> to vector<32x64xf32>
      %cst_13 = arith.constant dense<0.000000e+00> : vector<16x64xf32>
      %20 = tpu.matmul %14, %19, %cst_13 {dimension_numbers = #tpu.dot_dimension_numbers<[1], [0], [0], [1], [0, 0, 1, 1], [], []>} : vector<16x32xf32>, vector<32x64xf32>, vector<16x64xf32> -> vector<16x64xf32>
      %21 = arith.negf %17 : vector<16x64xf32>
      %22 = math.exp %21 : vector<16x64xf32>
      %cst_14 = arith.constant 1.000000e+00 : f32
      %23 = vector.broadcast %cst_14 : f32 to vector<16x64xf32>
      %24 = arith.addf %23, %22 : vector<16x64xf32>
      %25 = arith.divf %23, %24 : vector<16x64xf32>
      %26 = arith.mulf %17, %25 : vector<16x64xf32>
      %27 = arith.mulf %26, %20 : vector<16x64xf32>
      %c0_15 = arith.constant 0 : index
      %c0_16 = arith.constant 0 : index
      %c0_17 = arith.constant 0 : index
      %28 = vector.load %arg9[%c0_15, %c0_16, %c0_17] : memref<1x16x1xf32, #tpu.memory_space<vmem>>, vector<1x16x1xf32>
      %29 = vector.shape_cast %28 : vector<1x16x1xf32> to vector<16x1xf32>
      %30 = vector.broadcast %29 : vector<16x1xf32> to vector<16x64xf32>
      %31 = arith.mulf %27, %30 : vector<16x64xf32>
      %c0_18 = arith.constant 0 : index
      %c0_19 = arith.constant 0 : index
      %32 = vector.load %arg11[%c0_18, %c0_19] : memref<16x32xf32, #tpu.memory_space<vmem>>, vector<16x32xf32>
      %c0_20 = arith.constant 0 : index
      %c0_21 = arith.constant 0 : index
      %c0_22 = arith.constant 0 : index
      %33 = vector.load %arg8[%c0_20, %c0_21, %c0_22] : memref<1x64x32xf32, #tpu.memory_space<vmem>>, vector<1x64x32xf32>
      %34 = vector.shape_cast %33 : vector<1x64x32xf32> to vector<64x32xf32>
      %cst_23 = arith.constant dense<0.000000e+00> : vector<16x32xf32>
      %35 = tpu.matmul %31, %34, %cst_23 {dimension_numbers = #tpu.dot_dimension_numbers<[1], [0], [0], [1], [0, 0, 1, 1], [], []>} : vector<16x64xf32>, vector<64x32xf32>, vector<16x32xf32> -> vector<16x32xf32>
      %36 = arith.addf %32, %35 : vector<16x32xf32>
      %c0_24 = arith.constant 0 : index
      %c0_25 = arith.constant 0 : index
      %37 = vector.load %arg11[%c0_24, %c0_25] : memref<16x32xf32, #tpu.memory_space<vmem>>, vector<16x32xf32>
      tpu.vector_store %arg11[%c0_24, %c0_25], %36 {strides = array<i32>} : memref<16x32xf32, #tpu.memory_space<vmem>>, vector<16x32xf32>,
    } else {
    }
    %c0_i32_3 = arith.constant 0 : i32
    %9 = arith.cmpi eq, %arg1, %c0_i32_3 : i32
    %c7_i32 = arith.constant 7 : i32
    %10 = arith.cmpi eq, %arg2, %c7_i32 : i32
    %11 = arith.andi %9, %10 : i1
    %12 = arith.extui %11 : i1 to i32
    %c0_i32_4 = arith.constant 0 : i32
    %13 = arith.cmpi ne, %12, %c0_i32_4 : i32
    scf.if %13 {
      %c0_5 = arith.constant 0 : index
      %c0_6 = arith.constant 0 : index
      %14 = vector.load %arg11[%c0_5, %c0_6] : memref<16x32xf32, #tpu.memory_space<vmem>>, vector<16x32xf32>
      %c0_7 = arith.constant 0 : index
      %c0_8 = arith.constant 0 : index
      %15 = vector.load %arg10[%c0_7, %c0_8] : memref<16x32xf32, #tpu.memory_space<vmem>>, vector<16x32xf32>
      tpu.vector_store %arg10[%c0_7, %c0_8], %14 {strides = array<i32>} : memref<16x32xf32, #tpu.memory_space<vmem>>, vector<16x32xf32>,
    } else {
    }
    return
  }
  func.func @transform_0(%arg0: i32, %arg1: i32, %arg2: i32, %arg3: memref<8xi32, #tpu.memory_space<smem>>, %arg4: memref<1xi32, #tpu.memory_space<smem>>) -> (i32, i32) {
    %c0_i32 = arith.constant 0 : i32
    %c0_i32_0 = arith.constant 0 : i32
    return %arg0, %c0_i32 : i32, i32
  }
  func.func @transform_1(%arg0: i32, %arg1: i32, %arg2: i32, %arg3: memref<8xi32, #tpu.memory_space<smem>>, %arg4: memref<1xi32, #tpu.memory_space<smem>>) -> (i32, i32, i32) {
    %0 = arith.index_cast %arg2 : i32 to index
    %1 = memref.load %arg3[%0] : memref<8xi32, #tpu.memory_space<smem>>
    %c0_i32 = arith.constant 0 : i32
    %c0_i32_0 = arith.constant 0 : i32
    return %1, %c0_i32, %arg1 : i32, i32, i32
  }
  func.func @transform_2(%arg0: i32, %arg1: i32, %arg2: i32, %arg3: memref<8xi32, #tpu.memory_space<smem>>, %arg4: memref<1xi32, #tpu.memory_space<smem>>) -> (i32, i32, i32) {
    %0 = arith.index_cast %arg2 : i32 to index
    %1 = memref.load %arg3[%0] : memref<8xi32, #tpu.memory_space<smem>>
    %c0_i32 = arith.constant 0 : i32
    %c0_i32_0 = arith.constant 0 : i32
    return %1, %c0_i32, %arg1 : i32, i32, i32
  }
  func.func @transform_3(%arg0: i32, %arg1: i32, %arg2: i32, %arg3: memref<8xi32, #tpu.memory_space<smem>>, %arg4: memref<1xi32, #tpu.memory_space<smem>>) -> (i32, i32, i32) {
    %0 = arith.index_cast %arg2 : i32 to index
    %1 = memref.load %arg3[%0] : memref<8xi32, #tpu.memory_space<smem>>
    %c0_i32 = arith.constant 0 : i32
    %c0_i32_0 = arith.constant 0 : i32
    return %1, %arg1, %c0_i32 : i32, i32, i32
  }
  func.func @transform_4(%arg0: i32, %arg1: i32, %arg2: i32, %arg3: memref<8xi32, #tpu.memory_space<smem>>, %arg4: memref<1xi32, #tpu.memory_space<smem>>) -> (i32, i32, i32) {
    %0 = arith.index_cast %arg2 : i32 to index
    %1 = memref.load %arg3[%0] : memref<8xi32, #tpu.memory_space<smem>>
    %c0_i32 = arith.constant 0 : i32
    %c0_i32_0 = arith.constant 0 : i32
    return %1, %arg0, %c0_i32 : i32, i32, i32
  }
  func.func @transform_5(%arg0: i32, %arg1: i32, %arg2: i32, %arg3: memref<8xi32, #tpu.memory_space<smem>>, %arg4: memref<1xi32, #tpu.memory_space<smem>>) -> (i32, i32) {
    %c0_i32 = arith.constant 0 : i32
    %c0_i32_0 = arith.constant 0 : i32
    return %arg0, %c0_i32 : i32, i32
  }
}

</mosaic_0001>

<bundles_post_ra>
// kernel: sparse_moe_forward.2
= control target key start
LH: loop header
LB: loop body
LE: loop exit
PB: predicated region body
PF: predicated region fallthrough
CT: control target
= control target key end

     0   :  { %vm17_vm0 = vcmask 261120   ;;  %s165_s1 = inlined_call_operand.vmem [shape: f32[32,128], index: 1, kind: input, shape index: {}]   ;;  %s166_s0 = inlined_call_operand.vmem [shape: f32[16,32], index: 0, kind: input, shape index: {}]   ;;  %s167_s2 = inlined_call_operand.vmem [shape: f32[16,128], index: 2, kind: output, shape index: {}]  }
   0x1   :  { %v16_v0 = vld [vmem:[%s165_s1 + $0x18] sm:$0xff]  ;;  %v15_v1 = vld [vmem:[%s165_s1 + $0x10] sm:$0xff]  ;;  %v11_v2 = vld [vmem:[%s166_s0] sm:$0xff] }
   0x2   :  { %113 = vmatprep.subr.mxu0 %v16_v0  ;;  %v14_v3 = vld [vmem:[%s165_s1 + $0x8] sm:$0xff]  ;;  %121 = vmatprep.mubr.msk.f32.mxu0 %vm17_vm0, %v11_v2  ;;  %v13_v4 = vld [vmem:[%s165_s1] sm:$0xff] }
   0x3   :  { %114 = vmatpush3.msra.mxu0 %v16_v0  ;;  %v12_v5 = vld [vmem:[%s166_s0 + $0x8] sm:$0xff] }
   0x4   :  { %115 = vmatprep.subr.mxu0 %v15_v1 }
   0x5   :  { %116 = vmatpush3.msra.mxu0 %v15_v1 }
   0x6   :  { %117 = vmatprep.subr.mxu0 %v14_v3 }
   0x7   :  { %118 = vmatpush3.msra.mxu0 %v14_v3 }
   0x8   :  { %119 = vmatprep.subr.mxu0 %v13_v4 }
   0x9   :  { %120 = vmatpush3.msra.mxu0 %v13_v4 }
   0xa   :  { %122 = vmatmul.mubr.msk.f32.vlgmr.msra.gmra.mxu0 %vm17_vm0, %v12_v5 }
  0xca   :  { %v123_v6 = vpop.f32.mrf.mxu0 }
  0xcb   :  { %100 = vst [vmem:[%s167_s2 + $0x8] sm:$0xff] %v123_v6 }
  0xcc   :  { %v90_v7 = vpop.f32.mrf.mxu0 }
  0xcd   :  { %99 = vst [vmem:[%s167_s2] sm:$0xff] %v90_v7 }

// kernel: sparse_moe_forward.3
= control target key start
LH: loop header
LB: loop body
LE: loop exit
PB: predicated region body
PF: predicated region fallthrough
CT: control target
= control target key end

     0   :  { %s1228_s0 = inlined_call_operand.vmem [shape: s32[8], index: 0, kind: input, shape index: {}]   ;;  %s1229_s1 = inlined_call_operand.<no memory space> [shape: s32[1], index: 1, kind: input, shape index: {}]   ;;  %s1230_s2 = inlined_call_operand.vmem [shape: f32[16,32], index: 2, kind: input, shape index: {}]   ;;  %s1231_s3 = inlined_call_operand.vmem [shape: f32[8,32,64], index: 3, kind: input, shape index: {}]   ;;  %s1232_s4 = inlined_call_operand.vmem [shape: f32[8,32,64], index: 4, kind: input, shape index: {}]   ;;  %s1233_s5 = inlined_call_operand.vmem [shape: f32[8,64,32], index: 5, kind: input, shape index: {}]   ;;  %s1234_s6 = inlined_call_operand.vmem [shape: f32[8,16,1], index: 6, kind: input, shape index: {}]   ;;  %s1235_s7 = inlined_call_operand.hbm [shape: f32[16,32], index: 7, kind: output, shape index: {}]  }
   0x1   :  { %s12_s26 = sshll.u32 %s1228_s0, 4  ;;  %16 = sst [smem:[#allocation5]] %s1229_s1  ;;  %s13_s26 = int_to_ptr.vmem [resolvable:$true] %s12_s26 }
   0x2   :  { %s1008_s29 = scalar_lea.vmem %s13_s26, 16  ;;  %p1013_p1 = scmp.lt.s32.totalorder %s13_s26, %s13_s26 }
   0x3   :  { %p1009_p0 = scmp.ne.s32.totalorder %s13_s26, %s1008_s29  ;;  %p1014_p2 = scmp.lt.s32.totalorder %s1008_s29, %s1008_s29 }
   0x5   :  { %p1015_p3 = por %p1014_p2, %p1013_p1 }
   0x7   :  { %p1016_p4 = pnand %p1015_p3, %p1009_p0 }
   0x9   :  { %1019 = shalt.err (!%p1016_p4)  }
   0xa   :  { %s1074_s30 = smov [#allocation4]  }
   0xb   :  { %15 = dma.vmem_to_smem %s13_s26, 16, %s1074_s30, [#allocation3] }
   0xc   :  { %1056 = dma.done.wait [#allocation3], 16 }
   0xd   :  { %1057 = vsyncadd [#allocation3], 4294967280 }
   0xe   :  { %18 = sfence }
   0xf   :  { %19 = vsyncpa [#allocation7], 0  ;;  %s1126_s8 = smov 0   ;;  %s1128_s0 = smov 0  }
  0x10   :  { %s1130_s9 = smov 0  }
  0x11 LB: > { %s866_s1 = sadd.s32 4294967295, %s1072_s9   ;;  %s37_s10 = sadd.s32 1, %s1068_s0  ;;  %s1072_s9 = sphi %s1130_s9, %s25_s9   ;;  %s1068_s0 = sphi %s1128_s0, %s1238_s0   ;;  %s1064_s8 = sphi %s1126_s8, %s1237_s8  }
  0x12   : > { %p38_p5 = scmp.ge.s32.totalorder %s37_s10, 8  ;;  %p870_p6 = scmp.ge.s32.totalorder %s1072_s9, 1 }
  0x13   : > { %p297_p7 = scmp.lt.s32.totalorder %s1072_s9, 9 }
  0x14   : > { %s1240_s10 = smov (%p38_p5, %s37_s10), 0 }
  0x15   : > { %p298_p8 = pnand %p870_p6, %p297_p7 }
  0x16   : > { %s364_s11 = sld [smem:[#allocation4 + %s1064_s8]] (!%p298_p8)  ;;  %p410_p9 = scmp.eq.s32.totalorder (!%p298_p8), %s1064_s8, 0 }
  0x17   : > { %301 = sbr.rel (%p298_p8) target bundleno = 517 (0x205), region = 40  ;;  %s374_s12 = sld [smem:[#allocation4 + %s1064_s8]] (!%p298_p8) }
  0x18   : > { %s384_s13 = sld [smem:[#allocation4 + %s1064_s8]] (!%p298_p8) }
  0x19   : > { %s396_s14 = sld [smem:[#allocation4 + %s1064_s8]] (!%p298_p8) }
  0x1c   : > { %p365_p10 = scmp.lt.s32.totalorder %s364_s11, 7  ;;  %vm415_vm0 = vcmask (%p410_p9), 261120   ;;  %v1075_v0 = vmov (%p410_p9), 0.0  }
  0x1d   : > { %p375_p11 = scmp.lt.s32.totalorder %s374_s12, 7  ;;  %416 = vst.msk [vmem:[#allocation2] sm:$0xff] (%p410_p9), %vm415_vm0, %v1075_v0  ;;  %417 = vst.msk [vmem:[#allocation2 + $0x8] sm:$0xff] (%p410_p9), %vm415_vm0, %v1075_v0 }
  0x1e   : > { %s1242_s11 = smov (!%p365_p10, %s364_s11), 7  ;;  %p386_p12 = scmp.lt.s32.totalorder %s384_s13, 7 }
  0x1f   : > { %s1244_s12 = smov (!%p375_p11, %s374_s12), 7  ;;  %s894_s15 = sshll.u32 %s1242_s11, 5 }
  0x20   : > { %s1155_s18 = scalar_lea.vmem %s1231_s3, %s894_s15  ;;  %s895_s19 = sshll.u32 %s1244_s12, 5 }
  0x21   : > { %s1160_s22 = scalar_lea.vmem %s1232_s4, %s895_s19  ;;  %p398_p13 = scmp.lt.s32.totalorder %s396_s14, 7 }
  0x22   : > { %s1246_s13 = smov (!%p386_p12, %s384_s13), 7  ;;  %414 = sbr.rel (!%p410_p9) target bundleno = 39 (0x27), region = 44 }
  0x23   : > { %s1248_s14 = smov (!%p398_p13, %s396_s14), 7  ;;  %s896_s23 = sshll.u32 %s1246_s13, 6 }
  0x24   : > { %s1165_s26 = scalar_lea.vmem %s1233_s5, %s896_s23  ;;  %s897_s27 = sshll.u32 %s1248_s14, 4 }
  0x25   : > { %s405_s30 = scalar_lea.vmem %s1234_s6, %s897_s27 }
  0x27 PF: > { %s418_s11 = sld [smem:[#allocation5]] }
  0x2d   : > { %p880_p0 = scmp.ge.s32.totalorder %s1064_s8, %s418_s11 }
  0x2f   : > { %422 = sbr.rel (%p880_p0) target bundleno = 493 (0x1ed), region = 48 }
  0x34   : > { %v428_v1 = vld [vmem:[%s1155_s18 + $0x18] sm:$0xff]  ;;  %v427_v2 = vld [vmem:[%s1155_s18 + $0x10] sm:$0xff]  ;;  %vm429_vm1 = vcmask 261120   ;;  %v423_v3 = vld [vmem:[%s1230_s2] sm:$0xff]  ;;  %v1076_v4 = vmov 0   ;;  %vm630_vm2 = vcmask 523264  }
  0x35   : > { %922 = vmatprep.subr.mxu1 %v428_v1  ;;  %999 = vset.pattern.permute.xlu0 %v1076_v4  ;;  %v426_v5 = vld [vmem:[%s1155_s18 + $0x8] sm:$0xff]  ;;  %v606_v6 = vld [vmem:[%s405_s30] sm:$0xff]  ;;  %v514_v10 = vld [vmem:[%s1160_s22 + $0x18] sm:$0xff] }
  0x36   : > { %923 = vmatpush3.msra.mxu1 %v428_v1  ;;  %930 = vmatprep.mubr.msk.f32.mxu1 %vm429_vm1, %v423_v3  ;;  %v425_v7 = vld [vmem:[%s1155_s18] sm:$0xff]  ;;  %v607_v8 = vld [vmem:[%s405_s30 + $0x8] sm:$0xff]  ;;  %v513_v11 = vld [vmem:[%s1160_s22 + $0x10] sm:$0xff] }
  0x37   : > { %924 = vmatprep.subr.mxu1 %v427_v2  ;;  %610 = vperm.xlu0 %999, %v606_v6   ;;  %v424_v9 = vld [vmem:[%s1230_s2 + $0x8] sm:$0xff]  ;;  %v511_v13 = vld [vmem:[%s1160_s22] sm:$0xff]  ;;  %v629_v14 = vld [vmem:[%s1165_s26 + $0x38] sm:$0xff] }
  0x38   : > { %925 = vmatpush3.msra.mxu1 %v427_v2  ;;  %v512_v12 = vld [vmem:[%s1160_s22 + $0x8] sm:$0xff]  ;;  %944 = vmatprep.subr.mxu0 %v629_v14  ;;  %v628_v15 = vld [vmem:[%s1165_s26 + $0x30] sm:$0xff]  ;;  %v626_v17 = vld [vmem:[%s1165_s26 + $0x20] sm:$0xff] }
  0x39   : > { %926 = vmatprep.subr.mxu1 %v426_v5  ;;  %945 = vmatpush3.msra.mxu0 %v629_v14  ;;  %v627_v16 = vld [vmem:[%s1165_s26 + $0x28] sm:$0xff]  ;;  %v625_v18 = vld [vmem:[%s1165_s26 + $0x18] sm:$0xff]  ;;  %v624_v19 = vld [vmem:[%s1165_s26 + $0x10] sm:$0xff] }
  0x3a   : > { %927 = vmatpush3.msra.mxu1 %v426_v5  ;;  %946 = vmatprep.subr.mxu0 %v628_v15  ;;  %v623_v20 = vld [vmem:[%s1165_s26 + $0x8] sm:$0xff]  ;;  %v622_v21 = vld [vmem:[%s1165_s26] sm:$0xff] }
  0x3b   : > { %928 = vmatprep.subr.mxu1 %v425_v7  ;;  %615 = vperm.xlu0 %999, %v607_v8   ;;  %v621_v42 = vld [vmem:[#allocation2 + $0x8] sm:$0xff]  ;;  %v620_v44 = vld [vmem:[#allocation2] sm:$0xff] }
  0x3c   : > { %929 = vmatpush3.msra.mxu1 %v425_v7  ;;  %947 = vmatpush3.msra.mxu0 %v628_v15 }
  0x3d   : > { %931 = vmatmul.mubr.msk.f32.vlgmr.msra.gmra.mxu1 %vm429_vm1, %v424_v9  ;;  %933 = vmatprep.subr.mxu1 %v514_v10 }
  0x3e   : > { %934 = vmatpush3.msra.mxu1 %v514_v10  ;;  %941 = vmatprep.mubr.msk.f32.mxu1 %vm429_vm1, %v423_v3 }
  0x3f   : > { %935 = vmatprep.subr.mxu1 %v513_v11  ;;  %948 = vmatprep.subr.mxu0 %v627_v16 }
  0x40   : > { %936 = vmatpush3.msra.mxu1 %v513_v11  ;;  %949 = vmatpush3.msra.mxu0 %v627_v16 }
  0x41   : > { %937 = vmatprep.subr.mxu1 %v512_v12  ;;  %950 = vmatprep.subr.mxu0 %v626_v17 }
  0x42   : > { %938 = vmatpush3.msra.mxu1 %v512_v12  ;;  %951 = vmatpush3.msra.mxu0 %v626_v17 }
  0x43   : > { %939 = vmatprep.subr.mxu1 %v511_v13  ;;  %952 = vmatprep.subr.mxu0 %v625_v18 }
  0x44   : > { %940 = vmatpush3.msra.mxu1 %v511_v13  ;;  %953 = vmatpush3.msra.mxu0 %v625_v18 }
  0x45   : > { %942 = vmatmul.mubr.msk.f32.vlgmr.msra.gmra.mxu1 %vm429_vm1, %v424_v9  ;;  %954 = vmatprep.subr.mxu0 %v624_v19 }
  0x46   : > { %955 = vmatpush3.msra.mxu0 %v624_v19 }
  0x47   : > { %956 = vmatprep.subr.mxu0 %v623_v20 }
  0x48   : > { %957 = vmatpush3.msra.mxu0 %v623_v20 }
  0x49   : > { %958 = vmatprep.subr.mxu0 %v622_v21 }
  0x4a   : > { %959 = vmatpush3.msra.mxu0 %v622_v21 }
  0xb2   : > { %v611_v30 = vpop.permute.xlu0 %610 }
  0xb6   : > { %v616_v39 = vpop.permute.xlu0 %615 }
  0xfd   : > { %v932_v22 = vpop.f32.mrf.mxu1 }
  0xfe   : > { %v886_v23 = vmul.f32 -1.442695, %v932_v22 }
  0xff   : > { %v502_v24 = vpop.f32.mrf.mxu1 }
 0x100   : > { %1000 = vpow2.f32 %v886_v23  ;;  %v885_v25 = vmul.f32 -1.442695, %v502_v24 }
 0x102   : > { %1002 = vpow2.f32 %v885_v25 }
 0x105   : > { %v943_v32 = vpop.f32.mrf.mxu1 }
 0x107   : > { %v581_v37 = vpop.f32.mrf.mxu1 }
 0x10d   : > { %v1001_v26 = vpop.eup %1000 }
 0x10e   : > { %v597_v27 = vadd.f32 1.0, %v1001_v26 }
 0x10f   : > { %v1003_v28 = vpop.eup %1002 }
 0x110   : > { %1004 = vrcp.f32 %v597_v27  ;;  %v596_v29 = vadd.f32 1.0, %v1003_v28 }
 0x112   : > { %1006 = vrcp.f32 %v596_v29 }
 0x11d   : > { %v1005_v31 = vpop.eup %1004 }
 0x11e   : > { %v603_v33 = vmul.f32 %v1005_v31, %v932_v22 }
 0x11f   : > { %v1007_v34 = vpop.eup %1006 }
 0x120   : > { %v602_v35 = vmul.f32 %v1007_v34, %v502_v24  ;;  %v605_v36 = vmul.f32 %v943_v32, %v603_v33 }
 0x122   : > { %v604_v38 = vmul.f32 %v602_v35, %v581_v37  ;;  %v619_v41 = vmul.f32 %v616_v39, %v605_v36 }
 0x124   : > { %v618_v40 = vmul.f32 %v611_v30, %v604_v38 }
 0x126   : > { %960 = vmatprep.mubr.msk.f32.mxu0 %vm630_vm2, %v618_v40 }
 0x127   : > { %961 = vmatmul.mubr.msk.f32.vlgmr.msra.gmra.mxu0 %vm630_vm2, %v619_v41 }
 0x1e7   : > { %v962_v43 = vpop.f32.mrf.mxu0 }
 0x1e8   : > { %v713_v45 = vadd.f32 %v962_v43, %v621_v42 }
 0x1e9   : > { %v703_v46 = vpop.f32.mrf.mxu0 }
 0x1ea   : > { %715 = vst.msk [vmem:[#allocation2 + $0x8] sm:$0xff] %vm429_vm1, %v713_v45  ;;  %v712_v47 = vadd.f32 %v703_v46, %v620_v44 }
 0x1ec   : > { %714 = vst.msk [vmem:[#allocation2] sm:$0xff] %vm429_vm1, %v712_v47 }
 0x1ed PF: > { %p716_p1 = scmp.eq.s32.totalorder %s1064_s8, 7 }
 0x1ee   : > { %vm723_vm3 = vcmask (%p716_p1), 261120  }
 0x1ef   : > { %720 = sbr.rel (!%p716_p1) target bundleno = 501 (0x1f5), region = 52 }
 0x1f1   : > { %v722_v49 = vld [vmem:[#allocation2 + $0x8] sm:$0xff] (%p716_p1) }
 0x1f2   : > { %725 = vst.msk [vmem:[#allocation6 + $0x8] sm:$0xff] (%p716_p1), %vm723_vm3, %v722_v49 }
 0x1f3   : > { %v721_v48 = vld [vmem:[#allocation2] sm:$0xff] (%p716_p1) }
 0x1f4   : > { %724 = vst.msk [vmem:[#allocation6] sm:$0xff] %vm723_vm3, %v721_v48 }
 0x1f5 PF: > { %p1204_p2 = scmp.eq.s32.totalorder %s866_s1, 7  ;;  %s1077_s17 = smov [#allocation6]  }
 0x1f6   : > { %s735_s18 = sshll.u32 %s1077_s17, 4  ;;  %s736_s18 = int_to_ptr.vmem [resolvable:$true] %s735_s18 }
 0x1f7   : > { %s1020_s19 = scalar_lea.vmem %s736_s18, 256  ;;  %p1027_p6 = scmp.lt.s32.totalorder %s736_s18, %s736_s18 }
 0x1f8   : > { %p1021_p3 = scmp.ne.s32.totalorder %s736_s18, %s1020_s19  ;;  %p1028_p7 = scmp.lt.s32.totalorder %s1020_s19, %s1020_s19 }
 0x1fa   : > { %p1022_p4 = pnand %p1021_p3, %p1204_p2  ;;  %p1029_p8 = por %p1028_p7, %p1027_p6 }
 0x1fc   : > { %p1023_p5 = pneg %p1022_p4 }
 0x1fe   : > { %p1030_p9 = pnand %p1029_p8, %p1023_p5 }
 0x200   : > { %1033 = shalt.err (!%p1030_p9)
}
 0x201   : > { %s1078_s8 = smov 128   ;;  %s1079_s1 = smov 8  }
 0x202   : > { %964 = dma.vmem_to_hbm [thread:$0]  (%p1204_p2), %s736_s18, 256, %s1235_s7, [#allocation7], %s1078_s8, %s1078_s8, %s1079_s1  }
 0x203   : > { %1059 = dma.done.wait (%p1204_p2), [#allocation7], 256  }
 0x204   : > { %1061 = vsyncadd (%p1204_p2), [#allocation7], 4294967040 }
 0x205 PF: > { %s25_s9 = sadd.s32 1, %s1072_s9   ;;  %s1237_s8 = smov %s1068_s0 }
 0x206   : > { %p22_p10 = scmp.ge.s32.totalorder %s25_s9, 10   ;;  %s1238_s0 = smov %s1240_s10 }
 0x208   :  { %24 = sbr.rel (!%p22_p10) target bundleno = 17 (0x11), region = 92 }
 0x20d   :  { %751 = vsyncpa [#allocation7], 1 }
 0x20e   :  { %753 = vsyncpa [#allocation7 + $0x1], 1 }

</bundles_post_ra>
